<compile_context>
chip_gen: v5e
topology: v5e:2x2
jax: 0.10.0
libtpu: 0.0.40
codegen_flags: <defaults>
</compile_context>

<pallas_src>
import functools

import jax
import jax.numpy as jnp
from jax import lax
from jax.experimental import pallas as pl
from jax.experimental.pallas import tpu as pltpu


# ---------------------------------------------------------------------------
# Fused encoder-layer kernel (one grid step per batch element)
# ---------------------------------------------------------------------------
def _ln(x, g, b, eps):
    mu = jnp.mean(x, axis=-1, keepdims=True)
    var = jnp.mean(jnp.square(x - mu), axis=-1, keepdims=True)
    return (x - mu) * lax.rsqrt(var + eps) * g + b


def _encoder_layer_kernel(
    x1_ref, x2_ref,
    wq_ref, bq_ref, wkv_ref, bkv_ref,
    wo_ref, bo_ref,
    ln1_g_ref, ln1_b_ref,
    w1_ref, b1_ref, w2_ref, b2_ref,
    ln2_g_ref, ln2_b_ref,
    o_ref,
    *, nhead, eps,
):
    f32 = jnp.float32
    cdt = jnp.bfloat16
    D = wq_ref.shape[0]
    Dh = D // nhead

    x1 = x1_ref[0]          # (S, D) f32
    x2 = x2_ref[0]          # (S, D) f32 (kept f32 for residual / LN)

    # Fused projections on the bf16 MXU path, f32 accumulation.
    # The 1/sqrt(Dh) scale is pre-folded into wq / bq at prep time.
    q = jnp.dot(x1.astype(cdt), wq_ref[...],
                preferred_element_type=f32) + bq_ref[...]          # (S, D)
    kv = jnp.dot(x2.astype(cdt), wkv_ref[...],
                 preferred_element_type=f32) + bkv_ref[...]        # (S, 2D)

    # Head split -> (H, S, Dh): heads stacked along a leading batch axis,
    # then one batched contraction per attention matmul (no per-head loop
    # of tiny MXU pushes, no scratch stores).
    qb = q.astype(cdt)
    kvb = kv.astype(cdt)
    qh = jnp.stack([qb[:, h * Dh:(h + 1) * Dh] for h in range(nhead)], axis=0)
    kh = jnp.stack([kvb[:, h * Dh:(h + 1) * Dh] for h in range(nhead)], axis=0)
    vh = jnp.stack([kvb[:, D + h * Dh:D + (h + 1) * Dh]
                    for h in range(nhead)], axis=0)

    s = jnp.einsum('hqd,hkd->hqk', qh, kh,
                   preferred_element_type=f32)                     # (H, S, S)
    s = s - jnp.max(s, axis=-1, keepdims=True)
    p = jnp.exp(s)
    # approx reciprocal rides the EUP slot; rows sum to 1 within ~1e-3 rel.
    # Use an exact divide here if tight parity with PyTorch is required.
    p = p * pl.reciprocal(jnp.sum(p, axis=-1, keepdims=True), approx=True)
    ao = jnp.einsum('hqk,hkd->hqd', p.astype(cdt), vh,
                    preferred_element_type=f32)                    # (H, S, Dh)

    # Merge heads with a single lane-axis concat, then output projection.
    attn_cat = jnp.concatenate([ao[h] for h in range(nhead)],
                               axis=-1).astype(cdt)                # (S, D)
    attn = jnp.dot(attn_cat, wo_ref[...],
                   preferred_element_type=f32) + bo_ref[...]

    # residual + LayerNorm (post-norm), then FFN, residual + LayerNorm.
    h1 = _ln(x2 + attn, ln1_g_ref[...], ln1_b_ref[...], eps)

    ff = jnp.maximum(
        jnp.dot(h1.astype(cdt), w1_ref[...],
                preferred_element_type=f32) + b1_ref[...], 0.0)
    ff = jnp.dot(ff.astype(cdt), w2_ref[...],
                 preferred_element_type=f32) + b2_ref[...]

    o_ref[0] = _ln(h1 + ff, ln2_g_ref[...], ln2_b_ref[...], eps).astype(o_ref.dtype)


def _pick_vmem_limit_bytes():
    # Per-generation scoped-VMEM limit: ~3/4 of per-core capacity, capped.
    # (~48 MiB on v7x's 64 MiB; 96 MiB on v5e/v6e's 128 MiB.)
    try:
        cap = pltpu.get_tpu_info().vmem_capacity_bytes
        return int(min(cap * 3 // 4, 96 * 1024 * 1024))
    except Exception:
        return 32 * 1024 * 1024


def encoder_layer_forward(p, x1, x2, nhead, eps=1e-5):
    B, S, D = x1.shape

    inputs = (
        x1, x2,
        p["wq"], p["bq"], p["wkv"], p["bkv"],
        p["wo"], p["bo"],
        p["ln1_g"], p["ln1_b"],
        p["w1"], p["b1"], p["w2"], p["b2"],
        p["ln2_g"], p["ln2_b"],
    )

    act_spec = lambda: pl.BlockSpec((1, S, D), lambda b: (b, 0, 0))
    # Constant-index full-array weight specs (tiny at spec shapes); see the
    # module-level TODO about single-buffering them at production sizes.
    full2d = lambda a: pl.BlockSpec(a.shape, lambda b: (0, 0))
    in_specs = [act_spec(), act_spec()] + [full2d(a) for a in inputs[2:]]

    grid_spec = pltpu.PrefetchScalarGridSpec(
        num_scalar_prefetch=0,
        grid=(B,),
        in_specs=in_specs,
        out_specs=pl.BlockSpec((1, S, D), lambda b: (b, 0, 0)),
    )

    kernel = functools.partial(_encoder_layer_kernel, nhead=nhead, eps=eps)

    return pl.pallas_call(
        kernel,
        grid_spec=grid_spec,
        out_shape=jax.ShapeDtypeStruct((B, S, D), x2.dtype),
        input_output_aliases={1: 0},   # updated x2 reuses x2's buffer (P8)
        compiler_params=pltpu.CompilerParams(
            dimension_semantics=("parallel",),      # batch across TCs (v7x)
            vmem_limit_bytes=_pick_vmem_limit_bytes(),
        ),
    )(*inputs)


def model_forward(prepped_params, x1, x2, nhead):
    for p in prepped_params:
        x2 = encoder_layer_forward(p, x1, x2, nhead)
    return x2


# ---------------------------------------------------------------------------
# Parameter init + one-time preprocessing (hoisted out of the forward path)
# ---------------------------------------------------------------------------
def init_layer_params(key, d_model, dim_feedforward):
    ks = jax.random.split(key, 6)
    s_d = 1.0 / (d_model ** 0.5)
    s_f = 1.0 / (dim_feedforward ** 0.5)
    f32 = jnp.float32
    return dict(
        wq=jax.random.normal(ks[0], (d_model, d_model), f32) * s_d,
        wk=jax.random.normal(ks[1], (d_model, d_model), f32) * s_d,
        wv=jax.random.normal(ks[2], (d_model, d_model), f32) * s_d,
        wo=jax.random.normal(ks[3], (d_model, d_model), f32) * s_d,
        bq=jnp.zeros((d_model,), f32),
        bk=jnp.zeros((d_model,), f32),
        bv=jnp.zeros((d_model,), f32),
        bo=jnp.zeros((d_model,), f32),
        w1=jax.random.normal(ks[4], (d_model, dim_feedforward), f32) * s_d,
        b1=jnp.zeros((dim_feedforward,), f32),
        w2=jax.random.normal(ks[5], (dim_feedforward, d_model), f32) * s_f,
        b2=jnp.zeros((d_model,), f32),
        ln1_g=jnp.ones((d_model,), f32),
        ln1_b=jnp.zeros((d_model,), f32),
        ln2_g=jnp.ones((d_model,), f32),
        ln2_b=jnp.zeros((d_model,), f32),
    )


def prepare_layer_params(p, nhead):
    """One-time prep: fold 1/sqrt(Dh) into wq/bq, concat K/V weights into a
    single (D, 2D) slab, cast matmul weights to bf16 (MXU-native, halves
    weight HBM/VMEM); biases + LN params stay f32 (feed f32 accumulators)."""
    D = p["wq"].shape[0]
    F = p["w1"].shape[1]
    Dh = D // nhead
    scale = 1.0 / float(Dh) ** 0.5
    bf16 = jnp.bfloat16
    return dict(
        wq=(p["wq"] * scale).astype(bf16),
        bq=(p["bq"] * scale).reshape(1, D),
        wkv=jnp.concatenate([p["wk"], p["wv"]], axis=1).astype(bf16),
        bkv=jnp.concatenate([p["bk"], p["bv"]]).reshape(1, 2 * D),
        wo=p["wo"].astype(bf16),
        bo=p["bo"].reshape(1, D),
        ln1_g=p["ln1_g"].reshape(1, D), ln1_b=p["ln1_b"].reshape(1, D),
        w1=p["w1"].astype(bf16), b1=p["b1"].reshape(1, F),
        w2=p["w2"].astype(bf16), b2=p["b2"].reshape(1, D),
        ln2_g=p["ln2_g"].reshape(1, D), ln2_b=p["ln2_b"].reshape(1, D),
    )


# ---------------------------------------------------------------------------
if __name__ == "__main__":
    B, S = 2, 8
    d_model, nhead, dim_feedforward, num_layers = 32, 4, 64, 1

    key = jax.random.PRNGKey(0)
    k_x1, k_x2, k_p = jax.random.split(key, 3)

    x1 = jax.random.normal(k_x1, (B, S, d_model), jnp.float32)
    x2 = jax.random.normal(k_x2, (B, S, d_model), jnp.float32)

    layer_keys = jax.random.split(k_p, num_layers)
    params_list = [init_layer_params(lk, d_model, dim_feedforward)
                   for lk in layer_keys]
    # Hoisted one-time preprocessing (concat / scale-fold / bf16 cast).
    prepped = [prepare_layer_params(p, nhead) for p in params_list]

    fwd = jax.jit(functools.partial(model_forward, nhead=nhead))
    out = fwd(prepped, x1, x2)
    jax.block_until_ready(out)

    assert out.shape == (B, S, d_model) and out.dtype == jnp.float32
    assert bool(jnp.all(jnp.isfinite(out)))
    print("KERNEL_OK")
</pallas_src>

<mosaic_0001>
module attributes {stable_mosaic.version = 11 : i64} {
  func.func @_encoder_layer_kernel(%arg0: i32, %arg1: memref<1x8x32xf32, #tpu.memory_space<vmem>>, %arg2: memref<1x8x32xf32, #tpu.memory_space<vmem>>, %arg3: memref<32x32xbf16, #tpu.memory_space<vmem>>, %arg4: memref<1x32xf32, #tpu.memory_space<vmem>>, %arg5: memref<32x64xbf16, #tpu.memory_space<vmem>>, %arg6: memref<1x64xf32, #tpu.memory_space<vmem>>, %arg7: memref<32x32xbf16, #tpu.memory_space<vmem>>, %arg8: memref<1x32xf32, #tpu.memory_space<vmem>>, %arg9: memref<1x32xf32, #tpu.memory_space<vmem>>, %arg10: memref<1x32xf32, #tpu.memory_space<vmem>>, %arg11: memref<32x64xbf16, #tpu.memory_space<vmem>>, %arg12: memref<1x64xf32, #tpu.memory_space<vmem>>, %arg13: memref<64x32xbf16, #tpu.memory_space<vmem>>, %arg14: memref<1x32xf32, #tpu.memory_space<vmem>>, %arg15: memref<1x32xf32, #tpu.memory_space<vmem>>, %arg16: memref<1x32xf32, #tpu.memory_space<vmem>>, %arg17: memref<1x8x32xf32, #tpu.memory_space<vmem>>) attributes {dimension_semantics = [#tpu.dimension_semantics<parallel>], iteration_bounds = array<i64: 2>, scalar_prefetch = 0 : i64, scratch_operands = 0 : i64, tpu.core_type = #tpu.core_type<tc>, window_params = [{transform_indices = @transform_0, window_bounds = array<i64: 1, 8, 32>}, {transform_indices = @transform_1, window_bounds = array<i64: 1, 8, 32>}, {pipeline_mode = #tpu.pipeline_mode<synchronous>, transform_indices = @transform_2, window_bounds = array<i64: 32, 32>}, {pipeline_mode = #tpu.pipeline_mode<synchronous>, transform_indices = @transform_3, window_bounds = array<i64: 1, 32>}, {pipeline_mode = #tpu.pipeline_mode<synchronous>, transform_indices = @transform_4, window_bounds = array<i64: 32, 64>}, {pipeline_mode = #tpu.pipeline_mode<synchronous>, transform_indices = @transform_5, window_bounds = array<i64: 1, 64>}, {pipeline_mode = #tpu.pipeline_mode<synchronous>, transform_indices = @transform_6, window_bounds = array<i64: 32, 32>}, {pipeline_mode = #tpu.pipeline_mode<synchronous>, transform_indices = @transform_7, window_bounds = array<i64: 1, 32>}, {pipeline_mode = #tpu.pipeline_mode<synchronous>, transform_indices = @transform_8, window_bounds = array<i64: 1, 32>}, {pipeline_mode = #tpu.pipeline_mode<synchronous>, transform_indices = @transform_9, window_bounds = array<i64: 1, 32>}, {pipeline_mode = #tpu.pipeline_mode<synchronous>, transform_indices = @transform_10, window_bounds = array<i64: 32, 64>}, {pipeline_mode = #tpu.pipeline_mode<synchronous>, transform_indices = @transform_11, window_bounds = array<i64: 1, 64>}, {pipeline_mode = #tpu.pipeline_mode<synchronous>, transform_indices = @transform_12, window_bounds = array<i64: 64, 32>}, {pipeline_mode = #tpu.pipeline_mode<synchronous>, transform_indices = @transform_13, window_bounds = array<i64: 1, 32>}, {pipeline_mode = #tpu.pipeline_mode<synchronous>, transform_indices = @transform_14, window_bounds = array<i64: 1, 32>}, {pipeline_mode = #tpu.pipeline_mode<synchronous>, transform_indices = @transform_15, window_bounds = array<i64: 1, 32>}, {transform_indices = @transform_16, window_bounds = array<i64: 1, 8, 32>}]} {
    %c0 = arith.constant 0 : index
    %c0_0 = arith.constant 0 : index
    %c0_1 = arith.constant 0 : index
    %0 = vector.load %arg1[%c0, %c0_0, %c0_1] : memref<1x8x32xf32, #tpu.memory_space<vmem>>, vector<1x8x32xf32>
    %1 = vector.shape_cast %0 : vector<1x8x32xf32> to vector<8x32xf32>
    %c0_2 = arith.constant 0 : index
    %c0_3 = arith.constant 0 : index
    %c0_4 = arith.constant 0 : index
    %2 = vector.load %arg2[%c0_2, %c0_3, %c0_4] : memref<1x8x32xf32, #tpu.memory_space<vmem>>, vector<1x8x32xf32>
    %3 = vector.shape_cast %2 : vector<1x8x32xf32> to vector<8x32xf32>
    %4 = arith.truncf %1 : vector<8x32xf32> to vector<8x32xbf16>
    %c0_5 = arith.constant 0 : index
    %c0_6 = arith.constant 0 : index
    %5 = vector.load %arg3[%c0_5, %c0_6] : memref<32x32xbf16, #tpu.memory_space<vmem>>, vector<32x32xbf16>
    %cst = arith.constant dense<0.000000e+00> : vector<8x32xf32>
    %6 = tpu.matmul %4, %5, %cst {dimension_numbers = #tpu.dot_dimension_numbers<[1], [0], [0], [1], [0, 0, 1, 1], [], []>} : vector<8x32xbf16>, vector<32x32xbf16>, vector<8x32xf32> -> vector<8x32xf32>
    %c0_7 = arith.constant 0 : index
    %c0_8 = arith.constant 0 : index
    %7 = vector.load %arg4[%c0_7, %c0_8] : memref<1x32xf32, #tpu.memory_space<vmem>>, vector<1x32xf32>
    %8 = vector.broadcast %7 : vector<1x32xf32> to vector<8x32xf32>
    %9 = arith.addf %6, %8 : vector<8x32xf32>
    %10 = arith.truncf %3 : vector<8x32xf32> to vector<8x32xbf16>
    %c0_9 = arith.constant 0 : index
    %c0_10 = arith.constant 0 : index
    %11 = vector.load %arg5[%c0_9, %c0_10] : memref<32x64xbf16, #tpu.memory_space<vmem>>, vector<32x64xbf16>
    %cst_11 = arith.constant dense<0.000000e+00> : vector<8x64xf32>
    %12 = tpu.matmul %10, %11, %cst_11 {dimension_numbers = #tpu.dot_dimension_numbers<[1], [0], [0], [1], [0, 0, 1, 1], [], []>} : vector<8x32xbf16>, vector<32x64xbf16>, vector<8x64xf32> -> vector<8x64xf32>
    %c0_12 = arith.constant 0 : index
    %c0_13 = arith.constant 0 : index
    %13 = vector.load %arg6[%c0_12, %c0_13] : memref<1x64xf32, #tpu.memory_space<vmem>>, vector<1x64xf32>
    %14 = vector.broadcast %13 : vector<1x64xf32> to vector<8x64xf32>
    %15 = arith.addf %12, %14 : vector<8x64xf32>
    %16 = arith.truncf %9 : vector<8x32xf32> to vector<8x32xbf16>
    %17 = arith.truncf %15 : vector<8x64xf32> to vector<8x64xbf16>
    %18 = vector.extract_strided_slice %16 {offsets = [0, 0], sizes = [8, 8], strides = [1, 1]} : vector<8x32xbf16> to vector<8x8xbf16>
    %19 = vector.extract_strided_slice %16 {offsets = [0, 8], sizes = [8, 8], strides = [1, 1]} : vector<8x32xbf16> to vector<8x8xbf16>
    %20 = vector.extract_strided_slice %16 {offsets = [0, 16], sizes = [8, 8], strides = [1, 1]} : vector<8x32xbf16> to vector<8x8xbf16>
    %21 = vector.extract_strided_slice %16 {offsets = [0, 24], sizes = [8, 8], strides = [1, 1]} : vector<8x32xbf16> to vector<8x8xbf16>
    %22 = vector.shape_cast %18 : vector<8x8xbf16> to vector<1x8x8xbf16>
    %23 = vector.shape_cast %19 : vector<8x8xbf16> to vector<1x8x8xbf16>
    %24 = vector.shape_cast %20 : vector<8x8xbf16> to vector<1x8x8xbf16>
    %25 = vector.shape_cast %21 : vector<8x8xbf16> to vector<1x8x8xbf16>
    %26 = tpu.concatenate %22, %23, %24, %25 in 0 : vector<1x8x8xbf16>, vector<1x8x8xbf16>, vector<1x8x8xbf16>, vector<1x8x8xbf16> -> vector<4x8x8xbf16>
    %27 = vector.extract_strided_slice %17 {offsets = [0, 0], sizes = [8, 8], strides = [1, 1]} : vector<8x64xbf16> to vector<8x8xbf16>
    %28 = vector.extract_strided_slice %17 {offsets = [0, 8], sizes = [8, 8], strides = [1, 1]} : vector<8x64xbf16> to vector<8x8xbf16>
    %29 = vector.extract_strided_slice %17 {offsets = [0, 16], sizes = [8, 8], strides = [1, 1]} : vector<8x64xbf16> to vector<8x8xbf16>
    %30 = vector.extract_strided_slice %17 {offsets = [0, 24], sizes = [8, 8], strides = [1, 1]} : vector<8x64xbf16> to vector<8x8xbf16>
    %31 = vector.shape_cast %27 : vector<8x8xbf16> to vector<1x8x8xbf16>
    %32 = vector.shape_cast %28 : vector<8x8xbf16> to vector<1x8x8xbf16>
    %33 = vector.shape_cast %29 : vector<8x8xbf16> to vector<1x8x8xbf16>
    %34 = vector.shape_cast %30 : vector<8x8xbf16> to vector<1x8x8xbf16>
    %35 = tpu.concatenate %31, %32, %33, %34 in 0 : vector<1x8x8xbf16>, vector<1x8x8xbf16>, vector<1x8x8xbf16>, vector<1x8x8xbf16> -> vector<4x8x8xbf16>
    %36 = vector.extract_strided_slice %17 {offsets = [0, 32], sizes = [8, 8], strides = [1, 1]} : vector<8x64xbf16> to vector<8x8xbf16>
    %37 = vector.extract_strided_slice %17 {offsets = [0, 40], sizes = [8, 8], strides = [1, 1]} : vector<8x64xbf16> to vector<8x8xbf16>
    %38 = vector.extract_strided_slice %17 {offsets = [0, 48], sizes = [8, 8], strides = [1, 1]} : vector<8x64xbf16> to vector<8x8xbf16>
    %39 = vector.extract_strided_slice %17 {offsets = [0, 56], sizes = [8, 8], strides = [1, 1]} : vector<8x64xbf16> to vector<8x8xbf16>
    %40 = vector.shape_cast %36 : vector<8x8xbf16> to vector<1x8x8xbf16>
    %41 = vector.shape_cast %37 : vector<8x8xbf16> to vector<1x8x8xbf16>
    %42 = vector.shape_cast %38 : vector<8x8xbf16> to vector<1x8x8xbf16>
    %43 = vector.shape_cast %39 : vector<8x8xbf16> to vector<1x8x8xbf16>
    %44 = tpu.concatenate %40, %41, %42, %43 in 0 : vector<1x8x8xbf16>, vector<1x8x8xbf16>, vector<1x8x8xbf16>, vector<1x8x8xbf16> -> vector<4x8x8xbf16>
    "tpu.trace_start"() <{level = 10 : i32, message = "hqd,hkd->hqk"}> : () -> ()
    %cst_14 = arith.constant dense<0.000000e+00> : vector<4x8x8xf32>
    %45 = tpu.matmul %26, %35, %cst_14 {dimension_numbers = #tpu.dot_dimension_numbers<[2], [2], [1], [1], [0, 0, 0, 1, 1, 1], [0], [0]>} : vector<4x8x8xbf16>, vector<4x8x8xbf16>, vector<4x8x8xf32> -> vector<4x8x8xf32>
    "tpu.trace_stop"() : () -> ()
    %cst_15 = arith.constant dense<0xFF800000> : vector<4x8xf32>
    %46 = vector.multi_reduction <maximumf>, %45, %cst_15 [2] : vector<4x8x8xf32> to vector<4x8xf32>
    %47 = vector.shape_cast %46 : vector<4x8xf32> to vector<4x8x1xf32>
    %48 = vector.broadcast %47 : vector<4x8x1xf32> to vector<4x8x8xf32>
    %49 = arith.subf %45, %48 : vector<4x8x8xf32>
    %50 = math.exp %49 : vector<4x8x8xf32>
    %cst_16 = arith.constant dense<0.000000e+00> : vector<4x8xf32>
    %51 = vector.multi_reduction <add>, %50, %cst_16 [2] : vector<4x8x8xf32> to vector<4x8xf32>
    %52 = vector.shape_cast %51 : vector<4x8xf32> to vector<4x8x1xf32>
    %53 = tpu.reciprocal %52 {approx = true} : vector<4x8x1xf32> -> vector<4x8x1xf32>
    %54 = vector.broadcast %53 : vector<4x8x1xf32> to vector<4x8x8xf32>
    %55 = arith.mulf %50, %54 : vector<4x8x8xf32>
    %56 = arith.truncf %55 : vector<4x8x8xf32> to vector<4x8x8xbf16>
    "tpu.trace_start"() <{level = 10 : i32, message = "hqk,hkd->hqd"}> : () -> ()
    %cst_17 = arith.constant dense<0.000000e+00> : vector<4x8x8xf32>
    %57 = tpu.matmul %56, %44, %cst_17 {dimension_numbers = #tpu.dot_dimension_numbers<[2], [1], [1], [2], [0, 0, 0, 1, 1, 2], [0], [0]>} : vector<4x8x8xbf16>, vector<4x8x8xbf16>, vector<4x8x8xf32> -> vector<4x8x8xf32>
    "tpu.trace_stop"() : () -> ()
    %58 = vector.extract_strided_slice %57 {offsets = [0, 0, 0], sizes = [1, 8, 8], strides = [1, 1, 1]} : vector<4x8x8xf32> to vector<1x8x8xf32>
    %59 = vector.shape_cast %58 : vector<1x8x8xf32> to vector<8x8xf32>
    %60 = vector.extract_strided_slice %57 {offsets = [1, 0, 0], sizes = [1, 8, 8], strides = [1, 1, 1]} : vector<4x8x8xf32> to vector<1x8x8xf32>
    %61 = vector.shape_cast %60 : vector<1x8x8xf32> to vector<8x8xf32>
    %62 = vector.extract_strided_slice %57 {offsets = [2, 0, 0], sizes = [1, 8, 8], strides = [1, 1, 1]} : vector<4x8x8xf32> to vector<1x8x8xf32>
    %63 = vector.shape_cast %62 : vector<1x8x8xf32> to vector<8x8xf32>
    %64 = vector.extract_strided_slice %57 {offsets = [3, 0, 0], sizes = [1, 8, 8], strides = [1, 1, 1]} : vector<4x8x8xf32> to vector<1x8x8xf32>
    %65 = vector.shape_cast %64 : vector<1x8x8xf32> to vector<8x8xf32>
    %66 = tpu.concatenate %59, %61, %63, %65 in 1 : vector<8x8xf32>, vector<8x8xf32>, vector<8x8xf32>, vector<8x8xf32> -> vector<8x32xf32>
    %67 = arith.truncf %66 : vector<8x32xf32> to vector<8x32xbf16>
    %c0_18 = arith.constant 0 : index
    %c0_19 = arith.constant 0 : index
    %68 = vector.load %arg7[%c0_18, %c0_19] : memref<32x32xbf16, #tpu.memory_space<vmem>>, vector<32x32xbf16>
    %cst_20 = arith.constant dense<0.000000e+00> : vector<8x32xf32>
    %69 = tpu.matmul %67, %68, %cst_20 {dimension_numbers = #tpu.dot_dimension_numbers<[1], [0], [0], [1], [0, 0, 1, 1], [], []>} : vector<8x32xbf16>, vector<32x32xbf16>, vector<8x32xf32> -> vector<8x32xf32>
    %c0_21 = arith.constant 0 : index
    %c0_22 = arith.constant 0 : index
    %70 = vector.load %arg8[%c0_21, %c0_22] : memref<1x32xf32, #tpu.memory_space<vmem>>, vector<1x32xf32>
    %71 = vector.broadcast %70 : vector<1x32xf32> to vector<8x32xf32>
    %72 = arith.addf %69, %71 : vector<8x32xf32>
    %73 = arith.addf %3, %72 : vector<8x32xf32>
    %c0_23 = arith.constant 0 : index
    %c0_24 = arith.constant 0 : index
    %74 = vector.load %arg9[%c0_23, %c0_24] : memref<1x32xf32, #tpu.memory_space<vmem>>, vector<1x32xf32>
    %c0_25 = arith.constant 0 : index
    %c0_26 = arith.constant 0 : index
    %75 = vector.load %arg10[%c0_25, %c0_26] : memref<1x32xf32, #tpu.memory_space<vmem>>, vector<1x32xf32>
    %cst_27 = arith.constant dense<0.000000e+00> : vector<8xf32>
    %76 = vector.multi_reduction <add>, %73, %cst_27 [1] : vector<8x32xf32> to vector<8xf32>
    %77 = vector.shape_cast %76 : vector<8xf32> to vector<8x1xf32>
    %cst_28 = arith.constant 3.200000e+01 : f32
    %78 = vector.broadcast %cst_28 : f32 to vector<8x1xf32>
    %79 = arith.divf %77, %78 : vector<8x1xf32>
    %80 = vector.broadcast %79 : vector<8x1xf32> to vector<8x32xf32>
    %81 = arith.subf %73, %80 : vector<8x32xf32>
    %82 = arith.mulf %81, %81 : vector<8x32xf32>
    %cst_29 = arith.constant dense<0.000000e+00> : vector<8xf32>
    %83 = vector.multi_reduction <add>, %82, %cst_29 [1] : vector<8x32xf32> to vector<8xf32>
    %84 = vector.shape_cast %83 : vector<8xf32> to vector<8x1xf32>
    %cst_30 = arith.constant 3.200000e+01 : f32
    %85 = vector.broadcast %cst_30 : f32 to vector<8x1xf32>
    %86 = arith.divf %84, %85 : vector<8x1xf32>
    %87 = vector.broadcast %79 : vector<8x1xf32> to vector<8x32xf32>
    %88 = arith.subf %73, %87 : vector<8x32xf32>
    %cst_31 = arith.constant 9.99999974E-6 : f32
    %89 = vector.broadcast %cst_31 : f32 to vector<8x1xf32>
    %90 = arith.addf %86, %89 : vector<8x1xf32>
    %91 = math.rsqrt %90 : vector<8x1xf32>
    %92 = vector.broadcast %91 : vector<8x1xf32> to vector<8x32xf32>
    %93 = arith.mulf %88, %92 : vector<8x32xf32>
    %94 = vector.broadcast %74 : vector<1x32xf32> to vector<8x32xf32>
    %95 = arith.mulf %93, %94 : vector<8x32xf32>
    %96 = vector.broadcast %75 : vector<1x32xf32> to vector<8x32xf32>
    %97 = arith.addf %95, %96 : vector<8x32xf32>
    %98 = arith.truncf %97 : vector<8x32xf32> to vector<8x32xbf16>
    %c0_32 = arith.constant 0 : index
    %c0_33 = arith.constant 0 : index
    %99 = vector.load %arg11[%c0_32, %c0_33] : memref<32x64xbf16, #tpu.memory_space<vmem>>, vector<32x64xbf16>
    %cst_34 = arith.constant dense<0.000000e+00> : vector<8x64xf32>
    %100 = tpu.matmul %98, %99, %cst_34 {dimension_numbers = #tpu.dot_dimension_numbers<[1], [0], [0], [1], [0, 0, 1, 1], [], []>} : vector<8x32xbf16>, vector<32x64xbf16>, vector<8x64xf32> -> vector<8x64xf32>
    %c0_35 = arith.constant 0 : index
    %c0_36 = arith.constant 0 : index
    %101 = vector.load %arg12[%c0_35, %c0_36] : memref<1x64xf32, #tpu.memory_space<vmem>>, vector<1x64xf32>
    %102 = vector.broadcast %101 : vector<1x64xf32> to vector<8x64xf32>
    %103 = arith.addf %100, %102 : vector<8x64xf32>
    %cst_37 = arith.constant 0.000000e+00 : f32
    %104 = vector.broadcast %cst_37 : f32 to vector<8x64xf32>
    %105 = arith.maximumf %103, %104 : vector<8x64xf32>
    %106 = arith.truncf %105 : vector<8x64xf32> to vector<8x64xbf16>
    %c0_38 = arith.constant 0 : index
    %c0_39 = arith.constant 0 : index
    %107 = vector.load %arg13[%c0_38, %c0_39] : memref<64x32xbf16, #tpu.memory_space<vmem>>, vector<64x32xbf16>
    %cst_40 = arith.constant dense<0.000000e+00> : vector<8x32xf32>
    %108 = tpu.matmul %106, %107, %cst_40 {dimension_numbers = #tpu.dot_dimension_numbers<[1], [0], [0], [1], [0, 0, 1, 1], [], []>} : vector<8x64xbf16>, vector<64x32xbf16>, vector<8x32xf32> -> vector<8x32xf32>
    %c0_41 = arith.constant 0 : index
    %c0_42 = arith.constant 0 : index
    %109 = vector.load %arg14[%c0_41, %c0_42] : memref<1x32xf32, #tpu.memory_space<vmem>>, vector<1x32xf32>
    %110 = vector.broadcast %109 : vector<1x32xf32> to vector<8x32xf32>
    %111 = arith.addf %108, %110 : vector<8x32xf32>
    %112 = arith.addf %97, %111 : vector<8x32xf32>
    %c0_43 = arith.constant 0 : index
    %c0_44 = arith.constant 0 : index
    %113 = vector.load %arg15[%c0_43, %c0_44] : memref<1x32xf32, #tpu.memory_space<vmem>>, vector<1x32xf32>
    %c0_45 = arith.constant 0 : index
    %c0_46 = arith.constant 0 : index
    %114 = vector.load %arg16[%c0_45, %c0_46] : memref<1x32xf32, #tpu.memory_space<vmem>>, vector<1x32xf32>
    %cst_47 = arith.constant dense<0.000000e+00> : vector<8xf32>
    %115 = vector.multi_reduction <add>, %112, %cst_47 [1] : vector<8x32xf32> to vector<8xf32>
    %116 = vector.shape_cast %115 : vector<8xf32> to vector<8x1xf32>
    %cst_48 = arith.constant 3.200000e+01 : f32
    %117 = vector.broadcast %cst_48 : f32 to vector<8x1xf32>
    %118 = arith.divf %116, %117 : vector<8x1xf32>
    %119 = vector.broadcast %118 : vector<8x1xf32> to vector<8x32xf32>
    %120 = arith.subf %112, %119 : vector<8x32xf32>
    %121 = arith.mulf %120, %120 : vector<8x32xf32>
    %cst_49 = arith.constant dense<0.000000e+00> : vector<8xf32>
    %122 = vector.multi_reduction <add>, %121, %cst_49 [1] : vector<8x32xf32> to vector<8xf32>
    %123 = vector.shape_cast %122 : vector<8xf32> to vector<8x1xf32>
    %cst_50 = arith.constant 3.200000e+01 : f32
    %124 = vector.broadcast %cst_50 : f32 to vector<8x1xf32>
    %125 = arith.divf %123, %124 : vector<8x1xf32>
    %126 = vector.broadcast %118 : vector<8x1xf32> to vector<8x32xf32>
    %127 = arith.subf %112, %126 : vector<8x32xf32>
    %cst_51 = arith.constant 9.99999974E-6 : f32
    %128 = vector.broadcast %cst_51 : f32 to vector<8x1xf32>
    %129 = arith.addf %125, %128 : vector<8x1xf32>
    %130 = math.rsqrt %129 : vector<8x1xf32>
    %131 = vector.broadcast %130 : vector<8x1xf32> to vector<8x32xf32>
    %132 = arith.mulf %127, %131 : vector<8x32xf32>
    %133 = vector.broadcast %113 : vector<1x32xf32> to vector<8x32xf32>
    %134 = arith.mulf %132, %133 : vector<8x32xf32>
    %135 = vector.broadcast %114 : vector<1x32xf32> to vector<8x32xf32>
    %136 = arith.addf %134, %135 : vector<8x32xf32>
    %c0_52 = arith.constant 0 : index
    %c0_53 = arith.constant 0 : index
    %c0_54 = arith.constant 0 : index
    %137 = vector.load %arg17[%c0_52, %c0_53, %c0_54] : memref<1x8x32xf32, #tpu.memory_space<vmem>>, vector<1x8x32xf32>
    %138 = vector.shape_cast %137 : vector<1x8x32xf32> to vector<8x32xf32>
    %139 = vector.shape_cast %136 : vector<8x32xf32> to vector<1x8x32xf32>
    tpu.vector_store %arg17[%c0_52, %c0_53, %c0_54], %139 {strides = array<i32>} : memref<1x8x32xf32, #tpu.memory_space<vmem>>, vector<1x8x32xf32>,
    return
  }
  func.func @transform_0(%arg0: i32) -> (i32, i32, i32) {
    %c0_i32 = arith.constant 0 : i32
    %c0_i32_0 = arith.constant 0 : i32
    %c0_i32_1 = arith.constant 0 : i32
    return %arg0, %c0_i32, %c0_i32_0 : i32, i32, i32
  }
  func.func @transform_1(%arg0: i32) -> (i32, i32, i32) {
    %c0_i32 = arith.constant 0 : i32
    %c0_i32_0 = arith.constant 0 : i32
    %c0_i32_1 = arith.constant 0 : i32
    return %arg0, %c0_i32, %c0_i32_0 : i32, i32, i32
  }
  func.func @transform_2(%arg0: i32) -> (i32, i32) {
    %c0_i32 = arith.constant 0 : i32
    %c0_i32_0 = arith.constant 0 : i32
    %c0_i32_1 = arith.constant 0 : i32
    return %c0_i32, %c0_i32_0 : i32, i32
  }
  func.func @transform_3(%arg0: i32) -> (i32, i32) {
    %c0_i32 = arith.constant 0 : i32
    %c0_i32_0 = arith.constant 0 : i32
    %c0_i32_1 = arith.constant 0 : i32
    return %c0_i32, %c0_i32_0 : i32, i32
  }
  func.func @transform_4(%arg0: i32) -> (i32, i32) {
    %c0_i32 = arith.constant 0 : i32
    %c0_i32_0 = arith.constant 0 : i32
    %c0_i32_1 = arith.constant 0 : i32
    return %c0_i32, %c0_i32_0 : i32, i32
  }
  func.func @transform_5(%arg0: i32) -> (i32, i32) {
    %c0_i32 = arith.constant 0 : i32
    %c0_i32_0 = arith.constant 0 : i32
    %c0_i32_1 = arith.constant 0 : i32
    return %c0_i32, %c0_i32_0 : i32, i32
  }
  func.func @transform_6(%arg0: i32) -> (i32, i32) {
    %c0_i32 = arith.constant 0 : i32
    %c0_i32_0 = arith.constant 0 : i32
    %c0_i32_1 = arith.constant 0 : i32
    return %c0_i32, %c0_i32_0 : i32, i32
  }
  func.func @transform_7(%arg0: i32) -> (i32, i32) {
    %c0_i32 = arith.constant 0 : i32
    %c0_i32_0 = arith.constant 0 : i32
    %c0_i32_1 = arith.constant 0 : i32
    return %c0_i32, %c0_i32_0 : i32, i32
  }
  func.func @transform_8(%arg0: i32) -> (i32, i32) {
    %c0_i32 = arith.constant 0 : i32
    %c0_i32_0 = arith.constant 0 : i32
    %c0_i32_1 = arith.constant 0 : i32
    return %c0_i32, %c0_i32_0 : i32, i32
  }
  func.func @transform_9(%arg0: i32) -> (i32, i32) {
    %c0_i32 = arith.constant 0 : i32
    %c0_i32_0 = arith.constant 0 : i32
    %c0_i32_1 = arith.constant 0 : i32
    return %c0_i32, %c0_i32_0 : i32, i32
  }
  func.func @transform_10(%arg0: i32) -> (i32, i32) {
    %c0_i32 = arith.constant 0 : i32
    %c0_i32_0 = arith.constant 0 : i32
    %c0_i32_1 = arith.constant 0 : i32
    return %c0_i32, %c0_i32_0 : i32, i32
  }
  func.func @transform_11(%arg0: i32) -> (i32, i32) {
    %c0_i32 = arith.constant 0 : i32
    %c0_i32_0 = arith.constant 0 : i32
    %c0_i32_1 = arith.constant 0 : i32
    return %c0_i32, %c0_i32_0 : i32, i32
  }
  func.func @transform_12(%arg0: i32) -> (i32, i32) {
    %c0_i32 = arith.constant 0 : i32
    %c0_i32_0 = arith.constant 0 : i32
    %c0_i32_1 = arith.constant 0 : i32
    return %c0_i32, %c0_i32_0 : i32, i32
  }
  func.func @transform_13(%arg0: i32) -> (i32, i32) {
    %c0_i32 = arith.constant 0 : i32
    %c0_i32_0 = arith.constant 0 : i32
    %c0_i32_1 = arith.constant 0 : i32
    return %c0_i32, %c0_i32_0 : i32, i32
  }
  func.func @transform_14(%arg0: i32) -> (i32, i32) {
    %c0_i32 = arith.constant 0 : i32
    %c0_i32_0 = arith.constant 0 : i32
    %c0_i32_1 = arith.constant 0 : i32
    return %c0_i32, %c0_i32_0 : i32, i32
  }
  func.func @transform_15(%arg0: i32) -> (i32, i32) {
    %c0_i32 = arith.constant 0 : i32
    %c0_i32_0 = arith.constant 0 : i32
    %c0_i32_1 = arith.constant 0 : i32
    return %c0_i32, %c0_i32_0 : i32, i32
  }
  func.func @transform_16(%arg0: i32) -> (i32, i32, i32) {
    %c0_i32 = arith.constant 0 : i32
    %c0_i32_0 = arith.constant 0 : i32
    %c0_i32_1 = arith.constant 0 : i32
    return %arg0, %c0_i32, %c0_i32_0 : i32, i32, i32
  }
}

</mosaic_0001>

<bundles_post_ra>
// kernel: model_forward.1
= control target key start
LH: loop header
LB: loop body
LE: loop exit
PB: predicated region body
PF: predicated region fallthrough
CT: control target
= control target key end

     0   :  { %s2027_s0 = inlined_call_operand.vmem [shape: f32[2,8,32], index: 0, kind: input, shape index: {}]   ;;  %s2028_s1 = inlined_call_operand.hbm [shape: f32[2,8,32], index: 1, kind: input, shape index: {}, may-alias: {1,16}]   ;;  %s2029_s2 = inlined_call_operand.vmem [shape: bf16[32,32], index: 2, kind: input, shape index: {}]   ;;  %s2030_s3 = inlined_call_operand.vmem [shape: f32[1,32], index: 3, kind: input, shape index: {}]   ;;  %s2031_s4 = inlined_call_operand.vmem [shape: bf16[32,64], index: 4, kind: input, shape index: {}]   ;;  %s2032_s5 = inlined_call_operand.vmem [shape: f32[1,64], index: 5, kind: input, shape index: {}]   ;;  %s2033_s6 = inlined_call_operand.vmem [shape: bf16[32,32], index: 6, kind: input, shape index: {}]   ;;  %s2034_s7 = inlined_call_operand.vmem [shape: f32[1,32], index: 7, kind: input, shape index: {}]   ;;  %s2035_s8 = inlined_call_operand.vmem [shape: f32[1,32], index: 8, kind: input, shape index: {}]   ;;  %s2036_s9 = inlined_call_operand.vmem [shape: f32[1,32], index: 9, kind: input, shape index: {}]   ;;  %s2037_s10 = inlined_call_operand.hbm [shape: bf16[32,64], index: 10, kind: input, shape index: {}]   ;;  %s2038_s11 = inlined_call_operand.vmem [shape: f32[1,64], index: 11, kind: input, shape index: {}]   ;;  %s2039_s12 = inlined_call_operand.vmem [shape: bf16[64,32], index: 12, kind: input, shape index: {}]   ;;  %s2040_s13 = inlined_call_operand.vmem [shape: f32[1,32], index: 13, kind: input, shape index: {}]   ;;  %s2041_s14 = inlined_call_operand.hbm [shape: f32[1,32], index: 14, kind: input, shape index: {}]   ;;  %s2042_s15 = inlined_call_operand.hbm [shape: f32[1,32], index: 15, kind: input, shape index: {}]   ;;  %s2043_s16 = inlined_call_operand.hbm [shape: f32[2,8,32], index: 16, kind: output, shape index: {}, may-alias: {1,16}]  }
   0x1   :  { %2051 = sst [smem:[#allocation20_spill]] %s2027_s0 }
   0x2   :  { %2052 = sst [smem:[#allocation21_spill]] %s2037_s10 }
   0x3   :  { %2053 = sst [smem:[#allocation22_spill]] %s2041_s14 }
   0x4   :  { %2054 = sst [smem:[#allocation23_spill]] %s2042_s15 }
   0x5   :  { %2055 = sst [smem:[#allocation24_spill]] %s2043_s16 }
   0x6   :  { %21 = vsyncpa [#allocation3], 0 }
   0x7   :  { %23 = vsyncpa [#allocation3 + $0x1], 0 }
   0x8   :  { %24 = vsyncpa [#allocation6], 0 }
   0x9   :  { %25 = vsyncpa [#allocation9], 0 }
   0xa   :  { %26 = vsyncpa [#allocation4], 0 }
   0xb   :  { %28 = vsyncpa [#allocation4 + $0x1], 0  ;;  %s1765_s21 = smov 0   ;;  %s1767_s22 = smov 0  }
   0xc   :  { %s1769_s23 = smov 0   ;;  %s1771_s24 = smov 0  }
   0xd LB: > { %2056 = sst [smem:[#allocation15_spill]] %s1653_s21  ;;  %s1789_s28 = sadd.s32 4294967295, %s1665_s24   ;;  %s1665_s24 = sphi %s1771_s24, %s2076_s24   ;;  %s1661_s23 = sphi %s1769_s23, %s2078_s23   ;;  %s1657_s22 = sphi %s1767_s22, %s2080_s22   ;;  %s1653_s21 = sphi %s1765_s21, %s2079_s21  }
   0xe   : > { %2057 = sst [smem:[#allocation16_spill]] %s1661_s23  ;;  %p1262_p0 = scmp.ge.s32.totalorder %s1665_s24, 1 }
   0xf   : > { %s2058_s10 = sld [smem:[#allocation21_spill]]  ;;  %p81_p1 = scmp.eq.s32.totalorder %s1789_s28, 0 }
  0x10   : > { %p411_p2 = scmp.lt.s32.totalorder %s1665_s24, 3  ;;  %s1667_s30 = smov [#allocation5]  }
  0x11   : > { %s448_s0 = sshll.u32 %s1667_s30, 4  ;;  %s2060_s14 = sld [smem:[#allocation22_spill]]  ;;  %s449_s0 = int_to_ptr.vmem [resolvable:$true] %s448_s0 }
  0x12   : > { %p1794_p3 = pnand %p1262_p0, %p411_p2  ;;  %s2062_s15 = sld [smem:[#allocation23_spill]] }
  0x13   : > { %s1669_s18 = smov 64   ;;  %s1671_s25 = smov [#allocation8]  }
  0x14   : > { %p1369_p4 = pneg %p1794_p3  ;;  %s484_s26 = sshll.u32 %s1671_s25, 4  ;;  %s485_s26 = int_to_ptr.vmem [resolvable:$true] %s484_s26 }
  0x15   : > { %s446_s27 = sshll.u32 %s2058_s10, 4  ;;  %s1668_s10 = smov [#allocation7]   ;;  %s447_s27 = int_to_ptr.hbm [resolvable:$true] %s446_s27 }
  0x16   : > { %p1806_p6 = pnand %p1369_p4, %p81_p1  ;;  %s472_s17 = sshll.u32 %s1668_s10, 4  ;;  %s473_s17 = int_to_ptr.vmem [resolvable:$true] %s472_s17 }
  0x17   : > { %s470_s19 = sshll.u32 %s2060_s14, 4  ;;  %s1670_s14 = smov 4   ;;  %s471_s19 = int_to_ptr.hbm [resolvable:$true] %s470_s19 }
  0x18   : > { %s482_s30 = sshll.u32 %s2062_s15, 4  ;;  %s1261_s10 = sadd.s32 4294967294, %s1665_s24   ;;  %s483_s30 = int_to_ptr.hbm [resolvable:$true] %s482_s30 }
  0x19   : > { %1372 = dma.hbm_to_vmem [thread:$0]  (!%p1806_p6), %s447_s27, 256, %s449_s0, [#allocation6], %s1669_s18, %s1669_s18, %s1670_s14  }
  0x1a   : > { %1375 = dma.hbm_to_vmem [thread:$0]  (!%p1806_p6), %s471_s19, 16, %s473_s17, [#allocation6]  }
  0x1b   : > { %1378 = dma.hbm_to_vmem [thread:$0]  (!%p1806_p6), %s483_s30, 16, %s485_s26, [#allocation9]  }
  0x1c   : > { %s1821_s15 = sadd.s32 1, %s1665_s24   ;;  %s67_s16 = sadd.s32 1, %s1661_s23 }
  0x1d   : > { %2063 = sst [smem:[#allocation17_spill]] %s1821_s15  ;;  %s64_s14 = ssub.s32 %s1665_s24, %s1821_s15 }
  0x1e   : > { %p74_p7 = scmp.ne.s32.totalorder %s1661_s23, %s1657_s22  ;;  %p65_p8 = scmp.eq.s32.totalorder %s64_s14, 0 }
  0x1f   : > { %p75_p9 = scmp.eq.s32.totalorder %s1665_s24, 0  ;;  %p80_p10 = scmp.ne.s32.totalorder %s1657_s22, %s1653_s21 }
  0x20   : > { %p398_p11 = scmp.eq.s32.totalorder %s1789_s28, 1  ;;  %p404_p0 = scmp.eq.s32.totalorder %s1261_s10, 1 }
  0x21   : > { %s1833_s27 = scalar_select %p65_p8, %s1661_s23, %s67_s16  }
  0x22   : > { %p1837_p12 = por %p81_p1, %p80_p10  ;;  %p1841_p13 = por %p398_p11, %p74_p7 }
  0x23   : > { %2064 = sst [smem:[#allocation18_spill]] %s1833_s27  ;;  %p76_p2 = por %p75_p9, %p74_p7 }
  0x24   : > { %s502_s20 = sand.u32 1, %s1661_s23   ;;  %p1846_p4 = por %p404_p0, %p80_p10 }
  0x25   : > { %p1390_p6 = scmp.lt.s32.totalorder %s1665_s24, 2  ;;  %s1267_s17 = sshll.u32 %s502_s20, 3 }
  0x26   : > { %s2067_s30 = scalar_select %p1846_p4, 1, 0 }
  0x27   : > { %s1268_s16 = sshll.u32 %s1665_s24, 3  ;;  %s506_s27 = scalar_lea.vmem [#allocation2], %s1267_s17 }
  0x28   : > { %2068 = sst [smem:[#allocation19_spill]] %s2067_s30  ;;  %s510_s26 = scalar_lea.hbm %s2028_s1, %s1268_s16 }
  0x29   : > { %s512_s14 = sshll.u32 %s510_s26, 4  ;;  %s514_s15 = sshll.u32 %s506_s27, 4  ;;  %s513_s14 = int_to_ptr.hbm [resolvable:$true] %s512_s14  ;;  %s515_s15 = int_to_ptr.vmem [resolvable:$true] %s514_s15 }
  0x2a   : > { %p1855_p8 = pnand %p1390_p6, %p76_p2  ;;  %s503_s23 = scalar_lea.sflag [#allocation3], %s502_s20 }
  0x2b   : > { %s1561_s21 = sshra.s32 %s513_s14, 4  ;;  %s1568_s27 = scalar_lea.hbm %s2028_s1, 16  ;;  %s1562_s21 = int_to_ptr.hbm [resolvable:$true] %s1561_s21 }
  0x2c   : > { %s1563_s30 = scalar_lea.hbm %s1562_s21, 8  ;;  %p1565_p9 = pneg %p1855_p8 }
  0x2d   : > { %p1564_p7 = scmp.ne.s32.totalorder %s1562_s21, %s1563_s30  ;;  %p1569_p0 = scmp.lt.s32.totalorder %s1562_s21, %s2028_s1 }
  0x2e   : > { %p1570_p2 = scmp.lt.s32.totalorder %s1568_s27, %s1563_s30 }
  0x2f   : > { %p1566_p10 = pnand %p1565_p9, %p1564_p7 }
  0x30   : > { %p1571_p6 = por %p1570_p2, %p1569_p0 }
  0x31   : > { %p1567_p11 = pneg %p1566_p10 }
  0x33   : > { %p1572_p5 = pnand %p1571_p6, %p1567_p11 }
  0x35   : > { %1575 = shalt.err (!%p1572_p5)
}
  0x36   : > { %1382 = dma.hbm_to_vmem [thread:$0]  (!%p1855_p8), %s513_s14, 128, %s515_s15, %s503_s23  }
  0x37   : > { %523 = sbr.rel (%p1794_p3) target bundleno = 1915 (0x77b), region = 84  ;;  %s1872_s20 = sand.u32 (!%p1794_p3), 1, %s1657_s22  }
  0x38   : > { %s2050_s26 = sshll.u32 (!%p1794_p3), %s1872_s20, 3  ;;  %s526_s16 = scalar_lea.sflag (!%p1794_p3), [#allocation3], %s1872_s20 }
  0x39   : > { %s529_s21 = scalar_lea.vmem (!%p1794_p3), [#allocation2], %s2050_s26 }
  0x3c   : > { %1636 = dma.done.wait (%p1837_p12), %s526_s16, 128  }
  0x3d   : > { %1638 = vsyncadd (%p1837_p12), %s526_s16, 4294967168 }
  0x3e   : > { %1640 = dma.done.wait (%p81_p1), [#allocation6], 272  }
  0x3f   : > { %1642 = vsyncadd (%p81_p1), [#allocation6], 4294967024 }
  0x40   : > { %1644 = dma.done.wait (%p81_p1), [#allocation9], 16  }
  0x41   : > { %1646 = vsyncadd (%p81_p1), [#allocation9], 4294967280  ;;  %p598_p3 = scmp.lt.s32.totalorder %s1789_s28, 1  ;;  %s2070_s30 = sld [smem:[#allocation20_spill]]  ;;  %v1344_v0 = vld [vmem:[%s2031_s4 + $0x8] sm:$0xff]  ;;  %v1343_v1 = vld [vmem:[%s2031_s4] sm:$0xff] }
  0x42   : > { %v1901_v2 = vld [vmem:[%s529_s21] sm:$0xff]  ;;  %673 = vmatpush.bf16.msra.mxu1 %v1344_v0  ;;  %vm626_vm0 = vcmask 261120   ;;  %vm696_vm1 = vcmask 64512   ;;  %s1672_s0 = smov 112   ;;  %s1675_s10 = smov 96   ;;  %vm828_vm2 = vcmask 1043456  }
  0x43   : > { %s599_s15 = scalar_select %p598_p3, %s1789_s28, 1  ;;  %v1342_v3 = vld [vmem:[%s2029_s2 + $0x8] sm:$0xff]  ;;  %v1341_v4 = vld [vmem:[%s2029_s2] sm:$0xff]  ;;  %v643_v6 = vpack.c.bf16 %v1901_v2, %v1901_v2  ;;  %vm927_vm3 = vcmask 130048   ;;  %vm929_vm4 = vcmask 195584   ;;  %vm1083_vm9 = vcmask 523264  }
  0x44   : > { %636 = vmatpush.bf16.msra.mxu0 %v1342_v3  ;;  %v1440_v8 = vld [vmem:[%s2032_s5] ss:$0 sm:$0xff]  ;;  %s1676_s18 = smov 16   ;;  %s1677_s27 = smov 8  }
  0x45   : > { %s1275_s23 = sshll.u32 %s599_s15, 3  ;;  %v1441_v9 = vld [vmem:[%s2030_s3] ss:$0 sm:$0xff]  ;;  %s1678_s17 = smov 24  }
  0x46   : > { %674 = vmatpush.bf16.msra.mxu1 %v1343_v1 }
  0x47   : > { %s601_s14 = scalar_lea.vmem %s2070_s30, %s1275_s23  ;;  %s1673_s30 = smov 120  }
  0x48   : > { %v603_v5 = vld [vmem:[%s601_s14] sm:$0xff]  ;;  %637 = vmatpush.bf16.msra.mxu0 %v1341_v4  ;;  %s1674_s14 = smov 104  }
  0x49   : > { %v605_v7 = vpack.c.bf16 %v603_v5, %v603_v5  ;;  %1293 = vmatmul.msk.bf16.vlgmr.msra.gmra.mxu1 %vm626_vm0, %v643_v6 }
  0x4b   : > { %1284 = vmatmul.msk.bf16.vlgmr.msra.gmra.mxu0 %vm626_vm0, %v605_v7 }
  0xc6   : > { %v676_v10 = vpop.f32.mrf.mxu1 }
  0xc7   : > { %v677_v11 = vadd.f32 %v1440_v8, %v676_v10 }
  0xc8   : > { %v639_v12 = vpop.f32.mrf.mxu0 }
  0xc9   : > { %v640_v13 = vadd.f32 %v1441_v9, %v639_v12  ;;  %v1919_v14 = vpack.c.bf16 %v677_v11, %v677_v11 }
  0xcb   : > { %v680_v15 = vpack.c.bf16 %v640_v13, %v640_v13  ;;  %692 = vrot.lane.b32.xlu1 %v1919_v14, %s1672_s0  ;;  %690 = vrot.lane.b32.xlu0 %v1919_v14, %s1673_s30  ;;  %v701_v16 = vsel %vm696_vm1, %v1919_v14, 0  ;;  %v821_v60 = vunpack.c.l.b16 %v1919_v14 }
  0xcc   : > { %710 = vmatpush.bf16.xpose.msra.mxu2 %v701_v16 }
  0xcd   : > { %685 = vrot.lane.b32.xlu2 %v680_v15, %s1672_s0  ;;  %v822_v62 = vpack.c.b16 %v821_v60, %v821_v60 }
  0xce   : > { %v678_v17 = vpop.f32.mrf.mxu1 }
  0xd0   : > { %v641_v18 = vpop.f32.mrf.mxu0 }
  0xd3   : > { %694 = vrot.lane.b32.xlu1 %v1919_v14, %s1674_s14  ;;  %683 = vrot.lane.b32.xlu0 %v680_v15, %s1673_s30  ;;  %s1338_s30 = sshll.u32 %s1789_s28, 3  ;;  %s1135_s28 = scalar_lea.sflag [#allocation4], %s1872_s20 }
  0xd4   : > { %1294 = vmatmul.msk.bf16.vlgmr.msra.gmra.mxu2 %vm696_vm1, %v680_v15 }
  0xd5   : > { %687 = vrot.lane.b32.xlu2 %v680_v15, %s1674_s14 }
 0x127   : > { %v686_v23 = vpop.permute.xlu2 %685 }
 0x12f   : > { %v688_v27 = vpop.permute.xlu2 %687 }
 0x13d   : > { %v693_v19 = vpop.permute.xlu1 %692  ;;  %v691_v20 = vpop.permute.xlu0 %690 }
 0x13e   : > { %v720_v21 = vsel %vm696_vm1, %v691_v20, 0  ;;  %v739_v22 = vsel %vm696_vm1, %v693_v19, 0  ;;  %v868_v55 = vunpack.c.l.b16 %v693_v19  ;;  %v845_v56 = vunpack.c.l.b16 %v691_v20 }
 0x13f   : > { %729 = vmatpush.bf16.xpose.msra.mxu3 %v720_v21  ;;  %748 = vmatpush.bf16.xpose.msrb.mxu0 %v739_v22 }
 0x140   : > { %v869_v57 = vpack.c.b16 %v868_v55, %v868_v55  ;;  %v846_v58 = vpack.c.b16 %v845_v56, %v845_v56 }
 0x145   : > { %v695_v24 = vpop.permute.xlu1 %694  ;;  %v684_v25 = vpop.permute.xlu0 %683 }
 0x146   : > { %1295 = vmatmul.msk.bf16.vlgmr.msra.gmra.mxu3 %vm696_vm1, %v684_v25  ;;  %1296 = vmatmul.msk.bf16.vlgmr.msrb.gmra.mxu0 %vm696_vm1, %v686_v23  ;;  %v758_v26 = vsel %vm696_vm1, %v695_v24, 0  ;;  %v891_v59 = vunpack.c.l.b16 %v695_v24 }
 0x147   : > { %767 = vmatpush.bf16.xpose.msrb.mxu1 %v758_v26 }
 0x148   : > { %v892_v61 = vpack.c.b16 %v891_v59, %v891_v59 }
 0x14e   : > { %1297 = vmatmul.msk.bf16.vlgmr.msrb.gmra.mxu1 %vm696_vm1, %v688_v27 }
 0x157   : > { %v712_v28 = vpop.f32.mrf.mxu2 }
 0x158   : > { %v773_v39 = vsel %vm696_vm1, %v712_v28, -inf }
 0x15f   : > { %v714_v29 = vpop.f32.mrf.mxu2 }
 0x1c3   : > { %v750_v30 = vpop.f32.mrf.mxu0 }
 0x1c4   : > { %v779_v31 = vsel %vm696_vm1, %v750_v30, -inf }
 0x1c5   : > { %780 = vmax.xlane.f32.xlu1 %v779_v31 }
 0x1c9   : > { %v731_v32 = vpop.f32.mrf.mxu3 }
 0x1ca   : > { %v776_v33 = vsel %vm696_vm1, %v731_v32, -inf }
 0x1cb   : > { %v752_v34 = vpop.f32.mrf.mxu0  ;;  %v769_v35 = vpop.f32.mrf.mxu1  ;;  %777 = vmax.xlane.f32.xlu0 %v776_v33 }
 0x1cc   : > { %v782_v36 = vsel %vm696_vm1, %v769_v35, -inf }
 0x1cd   : > { %783 = vmax.xlane.f32.xlu2 %v782_v36 }
 0x1d1   : > { %v733_v37 = vpop.f32.mrf.mxu3 }
 0x1d2   : > { %v1346_v37 = vld [vmem:[%s2033_s6 + $0x8] sm:$0xff] }
 0x1d3   : > { %v771_v38 = vpop.f32.mrf.mxu1 }
 0x1d4   : > { %v1345_v38 = vld [vmem:[%s2033_s6] sm:$0xff] }
 0x1d5   : > { %774 = vmax.xlane.f32.xlu2 %v773_v39 }
 0x238   : > { %v781_v40 = vpop.xlane.xlu1 %780 }
 0x239   : > { %v787_v41 = vsub.f32 %v750_v30, %v781_v40 }
 0x23b   : > { %v793_v42 = vmul.f32 1.442695, %v787_v41 }
 0x23d   : > { %1449 = vpow2.f32 %v793_v42 }
 0x23e   : > { %v778_v43 = vpop.xlane.xlu0 %777 }
 0x23f   : > { %v786_v44 = vsub.f32 %v731_v32, %v778_v43 }
 0x240   : > { %v784_v45 = vpop.xlane.xlu2 %783 }
 0x241   : > { %v791_v46 = vmul.f32 1.442695, %v786_v44  ;;  %v788_v47 = vsub.f32 %v769_v35, %v784_v45 }
 0x243   : > { %v1450_v48 = vpop.eup %1449  ;;  %1451 = vpow2.f32 %v791_v46  ;;  %v795_v49 = vmul.f32 1.442695, %v788_v47  ;;  %v1442_v46 = vld [vmem:[%s2034_s7] ss:$0 sm:$0xff] }
 0x244   : > { %v803_v50 = vsel %vm696_vm1, %v1450_v48, 0.0 }
 0x245   : > { %1453 = vpow2.f32 %v795_v49  ;;  %804 = vadd.xlane.f32.xlu1 %v803_v50 }
 0x248   : > { %v775_v63 = vpop.xlane.xlu2 %774 }
 0x249   : > { %v1452_v51 = vpop.eup %1451  ;;  %v785_v0 = vsub.f32 %v712_v28, %v775_v63 }
 0x24a   : > { %v800_v52 = vsel %vm696_vm1, %v1452_v51, 0.0 }
 0x24b   : > { %v1454_v53 = vpop.eup %1453  ;;  %801 = vadd.xlane.f32.xlu0 %v800_v52  ;;  %v789_v1 = vmul.f32 1.442695, %v785_v0  ;;  %v1679_v52 = vmov 32.0   ;;  %v1347_v0 = vld [vmem:[#allocation5] sm:$0xff] }
 0x24c   : > { %v806_v54 = vsel %vm696_vm1, %v1454_v53, 0.0 }
 0x24d   : > { %807 = vadd.xlane.f32.xlu2 %v806_v54  ;;  %1455 = vpow2.f32 %v789_v1  ;;  %v1352_v1 = vld [vmem:[%s2039_s12 + $0x18] sm:$0xff] }
 0x253   : > { %v1456_v3 = vpop.eup %1455 }
 0x254   : > { %v797_v4 = vsel %vm696_vm1, %v1456_v3, 0.0 }
 0x25e   : > { %870 = vrot.lane.b32.xlu1 %v869_v57, %s1675_s10 }
 0x25f   : > { %847 = vrot.lane.b32.xlu0 %v846_v58, %s1675_s10 }
 0x265   : > { %893 = vrot.lane.b32.xlu2 %v892_v61, %s1675_s10 }
 0x266   : > { %823 = vrot.lane.b32.xlu1 %v822_v62, %s1675_s10 }
 0x289   : > { %798 = vadd.xlane.f32.xlu0 %v797_v4 }
 0x2b8   : > { %v805_v6 = vpop.xlane.xlu1 %804 }
 0x2be   : > { %v802_v7 = vpop.xlane.xlu0 %801 }
 0x2c0   : > { %v808_v5 = vpop.xlane.xlu2 %807 }
 0x2c1   : > { %1457 = vrcp.f32 %v808_v5  ;;  %v1351_v5 = vld [vmem:[%s2039_s12 + $0x10] sm:$0xff] }
 0x2c2   : > { %1459 = vrcp.f32 %v805_v6 }
 0x2c3   : > { %1461 = vrcp.f32 %v802_v7 }
 0x2c7   : > { %v1458_v8 = vpop.eup %1457 }
 0x2c8   : > { %v816_v9 = vmul.f32 %v1458_v8, %v1454_v53  ;;  %v894_v10 = vpop.permute.xlu2 %893  ;;  %v1460_v13 = vpop.eup %1459 }
 0x2c9   : > { %v899_v11 = vsel %vm828_vm2, %v894_v10, 0  ;;  %v1462_v14 = vpop.eup %1461  ;;  %v815_v15 = vmul.f32 %v1460_v13, %v1450_v48  ;;  %v1443_v13 = vld [vmem:[%s2035_s8] ss:$0 sm:$0xff] }
 0x2ca   : > { %v820_v12 = vpack.c.bf16 %v816_v9, %v816_v9  ;;  %908 = vmatpush.bf16.msra.mxu1 %v899_v11  ;;  %v814_v16 = vmul.f32 %v1462_v14, %v1452_v51 }
 0x2cb   : > { %v819_v21 = vpack.c.bf16 %v815_v15, %v815_v15  ;;  %v1444_v15 = vld [vmem:[%s2036_s9] ss:$0 sm:$0xff] }
 0x2cc   : > { %v818_v22 = vpack.c.bf16 %v814_v16, %v814_v16 }
 0x2cd   : > { %1301 = vmatmul.msk.bf16.vlgmr.msra.gmra.mxu1 %vm696_vm1, %v820_v12 }
 0x2d0   : > { %v871_v17 = vpop.permute.xlu1 %870 }
 0x2d1   : > { %v876_v18 = vsel %vm828_vm2, %v871_v17, 0  ;;  %v848_v19 = vpop.permute.xlu0 %847 }
 0x2d2   : > { %885 = vmatpush.bf16.msra.mxu0 %v876_v18  ;;  %v853_v20 = vsel %vm828_vm2, %v848_v19, 0 }
 0x2d3   : > { %862 = vmatpush.bf16.msrb.mxu3 %v853_v20  ;;  %v1350_v20 = vld [vmem:[%s2039_s12 + $0x8] sm:$0xff] }
 0x2d5   : > { %1300 = vmatmul.msk.bf16.vlgmr.msra.gmra.mxu0 %vm696_vm1, %v819_v21  ;;  %v1349_v21 = vld [vmem:[%s2039_s12] sm:$0xff] }
 0x2d6   : > { %1299 = vmatmul.msk.bf16.vlgmr.msrb.gmra.mxu3 %vm696_vm1, %v818_v22  ;;  %1091 = vmatpush.bf16.msrb.mxu0 %v1352_v1  ;;  %v1445_v22 = vld [vmem:[%s2038_s11] ss:$0 sm:$0xff] }
 0x2d8   : > { %v824_v23 = vpop.permute.xlu1 %823 }
 0x2d9   : > { %v830_v24 = vsel %vm828_vm2, %v824_v23, 0 }
 0x2da   : > { %839 = vmatpush.bf16.msrb.mxu2 %v830_v24  ;;  %1092 = vmatpush.bf16.msrb.mxu0 %v1351_v5 }
 0x2de   : > { %961 = vmatpush.bf16.msra.mxu2 %v1346_v37  ;;  %1093 = vmatpush.bf16.msrb.mxu0 %v1350_v20 }
 0x2e2   : > { %962 = vmatpush.bf16.msra.mxu2 %v1345_v38  ;;  %1094 = vmatpush.bf16.msrb.mxu0 %v1349_v21 }
 0x2fc   : > { %v799_v25 = vpop.xlane.xlu0 %798 }
 0x2fd   : > { %1463 = vrcp.f32 %v799_v25 }
 0x2fe   : > { %1465 = vrcp.f32 %v1679_v52 }
 0x303   : > { %v1464_v26 = vpop.eup %1463 }
 0x304   : > { %v813_v27 = vmul.f32 %v1464_v26, %v1456_v3  ;;  %v1466_v53 = vpop.eup %1465 }
 0x305   : > { %v975_v54 = vmul.f32 32.0, %v1466_v53  ;;  %vm979_vm5 = vweird.f32 %v1466_v53 }
 0x306   : > { %v817_v28 = vpack.c.bf16 %v813_v27, %v813_v27 }
 0x307   : > { %v976_v55 = vsub.f32 1.0, %v975_v54 }
 0x308   : > { %1298 = vmatmul.msk.bf16.vlgmr.msrb.gmra.mxu2 %vm696_vm1, %v817_v28  ;;  %v1446_v28 = vld [vmem:[%s2040_s13] ss:$0 sm:$0xff] }
 0x309   : > { %v977_v56 = vmul.f32 %v1466_v53, %v976_v55 }
 0x30b   : > { %v978_v57 = vadd.f32 %v1466_v53, %v977_v56 }
 0x30d   : > { %v980_v58 = vsel %vm979_vm5, %v1466_v53, %v978_v57 }
 0x34a   : > { %v910_v29 = vpop.f32.mrf.mxu1 }
 0x352   : > { %v887_v30 = vpop.f32.mrf.mxu0  ;;  %v912_v31 = vpop.f32.mrf.mxu1 }
 0x353   : > { %919 = vrot.lane.b32.xlu1 %v887_v30, %s1676_s18  ;;  %s2071_s18 = sld [smem:[#allocation24_spill]] }
 0x359   : > { %v864_v32 = vpop.f32.mrf.mxu3  ;;  %s1611_s0 = scalar_lea.hbm %s2071_s18, 16 }
 0x35a   : > { %v889_v33 = vpop.f32.mrf.mxu0  ;;  %915 = vrot.lane.b32.xlu2 %v864_v32, %s1677_s27  ;;  %s1145_s27 = scalar_lea.hbm %s2071_s18, %s1338_s30 }
 0x35b   : > { %s1149_s15 = sshll.u32 %s1145_s27, 4  ;;  %s1150_s15 = int_to_ptr.hbm [resolvable:$true] %s1149_s15 }
 0x35c   : > { %s1605_s21 = sshra.s32 %s1150_s15, 4  ;;  %s1606_s21 = int_to_ptr.hbm [resolvable:$true] %s1605_s21 }
 0x35d   : > { %s1607_s23 = scalar_lea.hbm %s1606_s21, 8  ;;  %p1612_p8 = scmp.lt.s32.totalorder %s1606_s21, %s2071_s18 }
 0x35e   : > { %p1608_p1 = scmp.ne.s32.totalorder %s1606_s21, %s1607_s23  ;;  %p1613_p7 = scmp.lt.s32.totalorder %s1611_s0, %s1607_s23 }
 0x360   : > { %p1609_p5 = pnand %p1608_p1, %p1841_p13  ;;  %p1614_p9 = por %p1613_p7, %p1612_p8 }
 0x361   : > { %v866_v34 = vpop.f32.mrf.mxu3 }
 0x362   : > { %923 = vrot.lane.b32.xlu2 %v910_v29, %s1678_s17  ;;  %s2072_s17 = sshll.u32 %s1872_s20, 3  ;;  %p1610_p12 = pneg %p1609_p5 }
 0x363   : > { %s597_s25 = scalar_lea.vmem [#allocation10], %s2072_s17 }
 0x364   : > { %s1147_s16 = sshll.u32 %s597_s25, 4  ;;  %p1615_p10 = pnand %p1614_p9, %p1610_p12  ;;  %s1148_s16 = int_to_ptr.vmem [resolvable:$true] %s1147_s16 }
 0x38b   : > { %v841_v35 = vpop.f32.mrf.mxu2 }
 0x393   : > { %v843_v36 = vpop.f32.mrf.mxu2 }
 0x3b4   : > { %v916_v39 = vpop.permute.xlu2 %915 }
 0x3b5   : > { %v926_v40 = vsel %vm696_vm1, %v841_v35, %v916_v39 }
 0x3bc   : > { %v924_v42 = vpop.permute.xlu2 %923 }
 0x3c5   : > { %v920_v41 = vpop.permute.xlu1 %919 }
 0x3c6   : > { %v928_v43 = vsel %vm927_vm3, %v926_v40, %v920_v41 }
 0x3c7   : > { %v930_v44 = vsel %vm929_vm4, %v928_v43, %v924_v42 }
 0x3c8   : > { %v931_v45 = vpack.c.bf16 %v930_v44, %v930_v44 }
 0x3ca   : > { %1310 = vmatmul.msk.bf16.vlgmr.msra.gmra.mxu2 %vm626_vm0, %v931_v45 }
 0x44d   : > { %v964_v47 = vpop.f32.mrf.mxu2 }
 0x44e   : > { %v965_v48 = vadd.f32 %v1442_v46, %v964_v47 }
 0x450   : > { %v968_v49 = vadd.f32 %v965_v48, %v1901_v2  ;;  %v1348_v2 = vld [vmem:[#allocation5 + $0x8] sm:$0xff]  ;;  %v1447_v48 = vld [vmem:[#allocation7] ss:$0 sm:$0xff] }
 0x451   : > { %1038 = vmatpush.bf16.msra.mxu3 %v1348_v2 }
 0x452   : > { %v971_v50 = vsel %vm626_vm0, %v968_v49, 0.0 }
 0x453   : > { %972 = vadd.xlane.f32.xlu1 %v971_v50 }
 0x455   : > { %v966_v51 = vpop.f32.mrf.mxu2  ;;  %1039 = vmatpush.bf16.msra.mxu3 %v1347_v0 }
 0x456   : > { %v1448_v51 = vld [vmem:[#allocation8] ss:$0 sm:$0xff] }
 0x4c6   : > { %v973_v59 = vpop.xlane.xlu1 %972 }
 0x4c7   : > { %v981_v60 = vmul.f32 %v980_v58, %v973_v59 }
 0x4c9   : > { %v982_v61 = vsub.f32 %v968_v49, %v981_v60 }
 0x4cb   : > { %v983_v62 = vmul.f32 %v982_v61, %v982_v61 }
 0x4cd   : > { %v984_v63 = vsel %vm626_vm0, %v983_v62, 0.0 }
 0x4ce   : > { %985 = vadd.xlane.f32.xlu2 %v984_v63 }
 0x541   : > { %v986_v3 = vpop.xlane.xlu2 %985 }
 0x542   : > { %v987_v4 = vmul.f32 %v986_v3, %v980_v58 }
 0x544   : > { %v988_v6 = vadd.f32 1e-05, %v987_v4 }
 0x546   : > { %1467 = vrsqrt.f32 %v988_v6  ;;  %vm995_vm7 = vweird.f32 %v988_v6 }
 0x54c   : > { %v1468_v7 = vpop.eup %1467 }
 0x54d   : > { %v990_v8 = vmul.f32 %v1468_v7, %v988_v6  ;;  %vm996_vm6 = vweird.f32 %v1468_v7 }
 0x54e   : > { %vm997_vm8 = vmor %vm995_vm7, %vm996_vm6 }
 0x54f   : > { %v991_v9 = vmul.f32 %v1468_v7, %v990_v8 }
 0x551   : > { %v992_v10 = vmul.f32 0.5, %v991_v9 }
 0x553   : > { %v993_v11 = vsub.f32 1.5, %v992_v10 }
 0x555   : > { %v994_v12 = vmul.f32 %v1468_v7, %v993_v11 }
 0x557   : > { %v998_v14 = vsel %vm997_vm8, %v1468_v7, %v994_v12 }
 0x558   : > { %v999_v16 = vmul.f32 %v998_v14, %v982_v61 }
 0x55a   : > { %v1003_v17 = vmul.f32 %v1443_v13, %v999_v16 }
 0x55c   : > { %v1007_v18 = vadd.f32 %v1444_v15, %v1003_v17 }
 0x55e   : > { %v1008_v19 = vpack.c.bf16 %v1007_v18, %v1007_v18 }
 0x560   : > { %1319 = vmatmul.msk.bf16.vlgmr.msra.gmra.mxu3 %vm626_vm0, %v1008_v19 }
 0x5e3   : > { %v1041_v23 = vpop.f32.mrf.mxu3 }
 0x5e4   : > { %v1042_v24 = vadd.f32 %v1445_v22, %v1041_v23 }
 0x5e6   : > { %v1045_v25 = vmax.f32 %v1042_v24, 0.0 }
 0x5e8   : > { %v1046_v26 = vpack.c.bf16 %v1045_v25, %v1045_v25 }
 0x5ea   : > { %1336 = vmatmul.msk.bf16.vlgmr.msrb.gmra.mxu0 %vm1083_vm9, %v1046_v26 }
 0x5eb   : > { %v1043_v27 = vpop.f32.mrf.mxu3 }
 0x667   : > { %v1096_v29 = vpop.f32.mrf.mxu0 }
 0x668   : > { %v1097_v30 = vadd.f32 %v1446_v28, %v1096_v29 }
 0x66a   : > { %v1100_v31 = vadd.f32 %v1097_v30, %v1007_v18 }
 0x66c   : > { %v1103_v32 = vsel %vm626_vm0, %v1100_v31, 0.0 }
 0x66d   : > { %1104 = vadd.xlane.f32.xlu0 %v1103_v32 }
 0x66f   : > { %v1098_v33 = vpop.f32.mrf.mxu0 }
 0x6e0   : > { %v1105_v34 = vpop.xlane.xlu0 %1104 }
 0x6e1   : > { %v1106_v35 = vmul.f32 %v1105_v34, %v980_v58 }
 0x6e3   : > { %v1107_v36 = vsub.f32 %v1100_v31, %v1106_v35 }
 0x6e5   : > { %v1108_v37 = vmul.f32 %v1107_v36, %v1107_v36 }
 0x6e7   : > { %v1109_v38 = vsel %vm626_vm0, %v1108_v37, 0.0 }
 0x6e8   : > { %1110 = vadd.xlane.f32.xlu0 %v1109_v38 }
 0x75b   : > { %v1111_v39 = vpop.xlane.xlu0 %1110 }
 0x75c   : > { %v1112_v40 = vmul.f32 %v1111_v39, %v980_v58 }
 0x75e   : > { %v1113_v41 = vadd.f32 1e-05, %v1112_v40 }
 0x760   : > { %1469 = vrsqrt.f32 %v1113_v41  ;;  %vm1120_vm11 = vweird.f32 %v1113_v41 }
 0x766   : > { %v1470_v42 = vpop.eup %1469 }
 0x767   : > { %v1115_v43 = vmul.f32 %v1470_v42, %v1113_v41  ;;  %vm1121_vm10 = vweird.f32 %v1470_v42 }
 0x768   : > { %vm1122_vm12 = vmor %vm1120_vm11, %vm1121_vm10 }
 0x769   : > { %v1116_v44 = vmul.f32 %v1470_v42, %v1115_v43 }
 0x76b   : > { %v1117_v45 = vmul.f32 0.5, %v1116_v44 }
 0x76d   : > { %v1118_v46 = vsub.f32 1.5, %v1117_v45 }
 0x76f   : > { %v1119_v47 = vmul.f32 %v1470_v42, %v1118_v46 }
 0x771   : > { %v1123_v49 = vsel %vm1122_vm12, %v1470_v42, %v1119_v47 }
 0x772   : > { %v1124_v50 = vmul.f32 %v1123_v49, %v1107_v36 }
 0x774   : > { %v1128_v52 = vmul.f32 %v1447_v48, %v1124_v50 }
 0x776   : > { %v1132_v53 = vadd.f32 %v1448_v51, %v1128_v52 }
 0x778   : > { %1133 = vst.msk [vmem:[%s597_s25] sm:$0xff] %vm626_vm0, %v1132_v53 }
 0x779   : > { %1618 = shalt.err (!%p1615_p10)
}
 0x77a   : > { %1367 = dma.vmem_to_hbm [thread:$0]  (%p1841_p13), %s1148_s16, 128, %s1150_s15, %s1135_s28  }
 0x77b PF: > { %s2073_s20 = sld [smem:[#allocation15_spill]]  ;;  %p2075_p11 = scmp.ge.s32.totalorder %s1665_s24, 2 }
 0x77d   : > { %p1384_p0 = pnand %p2075_p11, %p1846_p4 }
 0x77f   : > { %p1385_p2 = pneg %p1384_p0 }
 0x781   : > { %s1161_s27 = sand.u32 1, %s2073_s20  }
 0x782   : > { %s1162_s17 = scalar_lea.sflag [#allocation4], %s1161_s27 }
 0x783   : > { %1648 = dma.done.wait (%p1385_p2), %s1162_s17, 128  }
 0x784   : > { %1650 = vsyncadd (%p1385_p2), %s1162_s17, 4294967168  ;;  %s2076_s24 = sld [smem:[#allocation17_spill]]  ;;  %s2079_s21 = smov %s1657_s22 }
 0x785   : > { %s2077_s25 = sld [smem:[#allocation16_spill]] }
 0x786   : > { %s2078_s23 = sld [smem:[#allocation18_spill]] }
 0x78a   : > { %p31_p6 = scmp.ge.s32.totalorder %s2076_s24, 4  }
 0x78b   : > { %s2080_s22 = smov %s2077_s25 }
 0x78c   :  { %33 = sbr.rel (!%p31_p6) target bundleno = 13 (0xd), region = 144 }
 0x791   :  { %1168 = vsyncpa [#allocation3], 1 }
 0x792   :  { %1170 = vsyncpa [#allocation3 + $0x1], 1 }
 0x793   :  { %1171 = vsyncpa [#allocation6], 1 }
 0x794   :  { %1172 = vsyncpa [#allocation9], 1 }
 0x795   :  { %1173 = vsyncpa [#allocation4], 1 }
 0x796   :  { %1175 = vsyncpa [#allocation4 + $0x1], 1 }

</bundles_post_ra>
